<compile_context>
chip_gen: v5e
topology: v5e:2x2
jax: 0.10.0
libtpu: 0.0.40
codegen_flags: <defaults>
</compile_context>

<pallas_src>
import functools
import math

import jax
import jax.numpy as jnp
from jax.experimental import pallas as pl
from jax.experimental.pallas import tpu as pltpu


LANE = 128
SMALL_N_THRESHOLD = 1 << 18  # below this, fused XLA beats a custom call


# ----------------------------------------------------------------------------
# Kernel: elementwise scaled leaky-relu on one (block_rows, 128) tile
# ----------------------------------------------------------------------------
def _scaled_leaky_relu_kernel(x_ref, o_ref, *, negative_slope, gain):
    x = x_ref[...]
    # where() is correct for ANY negative_slope (the max() identity only holds
    # for 0 <= slope <= 1).  Still trivially VPU-cheap; the op is HBM-bound.
    o_ref[...] = jnp.where(x >= 0, x * gain, x * (negative_slope * gain))


def _tpu_generation():
    """Best-effort TPU generation detection (5 / 6 / 7), None if unknown."""
    try:
        kind = jax.devices()[0].device_kind.lower()
    except Exception:
        return None
    for gen in (7, 6, 5):
        if f"v{gen}" in kind:
            return gen
    return None


# ----------------------------------------------------------------------------
# Wrapper: flatten -> lane-dense (rows, 128) layout -> tiled pallas_call
# ----------------------------------------------------------------------------
def scaled_leaky_relu(x, negative_slope=0.2, *, force_pallas=False,
                      _block_rows_override=None):
    orig_shape = x.shape
    dtype = x.dtype
    n = x.size
    gain = math.sqrt(2.0)

    if n == 0:
        return x

    # ---- small-size fallback: let XLA fuse this 3-op epilogue in place ----
    if not force_pallas and n < SMALL_N_THRESHOLD:
        return (jnp.where(x >= 0, x, x * negative_slope) * gain).astype(dtype)

    itemsize = jnp.dtype(dtype).itemsize
    # sublane packing: 8 rows for f32, 16 for bf16, 32 for int8/fp8
    sublane = max(8, 32 // max(itemsize, 1))

    # ---- per-generation tile sizing (constant ~bytes per tile) ----
    gen = _tpu_generation()
    if gen == 7:
        tile_bytes = 8 << 20          # 8 MiB tiles, raise scoped VMEM limit
        vmem_limit = 48 << 20
    elif gen == 6:
        tile_bytes = 4 << 20          # fits the 32 MiB scoped default
        vmem_limit = None
    else:                             # v5e or unknown: conservative
        tile_bytes = 2 << 20
        vmem_limit = None
    max_block_rows = max(
        sublane, (tile_bytes // (LANE * itemsize)) // sublane * sublane)

    # ---- lane-dense layout; pad only when n is not a multiple of 128 ----
    xf = jnp.ravel(x)
    if n % LANE == 0:
        rows = n // LANE
        padded = n
    else:
        rows = ((pl.cdiv(n, LANE) + sublane - 1) // sublane) * sublane
        padded = rows * LANE
        xf = jnp.pad(xf, (0, padded - n))
    x2 = xf.reshape(rows, LANE)

    # ---- block-row selection ----
    if _block_rows_override is not None:
        block_rows = int(_block_rows_override)
    elif rows <= max_block_rows:
        block_rows = rows             # single grid step (full-array block)
    else:
        block_rows = max_block_rows   # sublane-aligned; partial tail is masked

    # v7x: make sure medium (>=2 MiB) single-block inputs still split across
    # the two TensorCores via the "parallel" grid axis.
    if (gen == 7 and _block_rows_override is None and block_rows == rows
            and rows >= 2 * sublane
            and rows * LANE * itemsize >= (2 << 20)):
        block_rows = (((rows + 1) // 2 + sublane - 1) // sublane) * sublane

    grid = pl.cdiv(rows, block_rows)

    kern = functools.partial(
        _scaled_leaky_relu_kernel,
        negative_slope=float(negative_slope),
        gain=gain,
    )

    out2 = pl.pallas_call(
        kern,
        out_shape=jax.ShapeDtypeStruct((rows, LANE), dtype),
        grid=(grid,),
        in_specs=[pl.BlockSpec((block_rows, LANE), lambda i: (i, 0))],
        out_specs=pl.BlockSpec((block_rows, LANE), lambda i: (i, 0)),
        compiler_params=pltpu.CompilerParams(
            dimension_semantics=("parallel",),   # shard tiles on v7x 2 TCs
            vmem_limit_bytes=vmem_limit),
        cost_estimate=pl.CostEstimate(
            flops=2 * padded, transcendentals=0,
            bytes_accessed=2 * padded * itemsize),
    )(x2)

    out_flat = out2.reshape(-1)
    if padded != n:
        out_flat = out_flat[:n]
    return out_flat.reshape(orig_shape)


# ----------------------------------------------------------------------------
# Pure-JAX reference (mirrors F.leaky_relu(x, slope) * sqrt(2))
# ----------------------------------------------------------------------------
def reference(x, negative_slope=0.2):
    return jnp.where(x >= 0, x, x * negative_slope) * math.sqrt(2.0)


# ----------------------------------------------------------------------------
if __name__ == "__main__":
    key = jax.random.PRNGKey(0)
    k1, k2, k3 = jax.random.split(key, 3)

    # 1) small NCHW activation (StyleGAN2-like); force the Pallas path so the
    #    kernel itself is exercised (default would take the fused-XLA fallback)
    x = jax.random.normal(k1, (2, 4, 16, 16), jnp.float32)
    out = jax.block_until_ready(scaled_leaky_relu(x, 0.2, force_pallas=True))
    ref = jax.block_until_ready(reference(x, 0.2))
    assert out.shape == x.shape
    assert jnp.allclose(out, ref, atol=1e-6, rtol=1e-6), \
        f"max abs err = {jnp.max(jnp.abs(out - ref))}"

    # 2) odd size: exercises lane padding + trailing slice path
    y = jax.random.normal(k2, (3, 5, 7, 11), jnp.float32)
    out_y = jax.block_until_ready(scaled_leaky_relu(y, 0.2, force_pallas=True))
    ref_y = jax.block_until_ready(reference(y, 0.2))
    assert out_y.shape == y.shape
    assert jnp.allclose(out_y, ref_y, atol=1e-6, rtol=1e-6), \
        f"max abs err = {jnp.max(jnp.abs(out_y - ref_y))}"

    # 3) multi-tile grid with a partial (masked) last block, via a small
    #    block-rows override so the test stays tiny: 20 rows / block of 8
    z = jax.random.normal(k3, (2, 4, 20, 16), jnp.float32)
    out_z = jax.block_until_ready(
        scaled_leaky_relu(z, 0.2, force_pallas=True, _block_rows_override=8))
    ref_z = jax.block_until_ready(reference(z, 0.2))
    assert jnp.allclose(out_z, ref_z, atol=1e-6, rtol=1e-6), \
        f"max abs err = {jnp.max(jnp.abs(out_z - ref_z))}"

    # 4) default (auto) path: small input takes the fused-XLA fallback
    out_d = jax.block_until_ready(scaled_leaky_relu(x, 0.2))
    assert jnp.allclose(out_d, ref, atol=1e-6, rtol=1e-6)

    print("KERNEL_OK")
</pallas_src>

<mosaic_0001>
module attributes {stable_mosaic.version = 11 : i64} {
  func.func @_scaled_leaky_relu_kernel(%arg0: i32, %arg1: memref<16x128xf32, #tpu.memory_space<vmem>>, %arg2: memref<16x128xf32, #tpu.memory_space<vmem>>) attributes {dimension_semantics = [#tpu.dimension_semantics<parallel>], iteration_bounds = array<i64: 1>, scalar_prefetch = 0 : i64, scratch_operands = 0 : i64, tpu.core_type = #tpu.core_type<tc>, window_params = [{transform_indices = @transform_0, window_bounds = array<i64: 16, 128>}, {transform_indices = @transform_1, window_bounds = array<i64: 16, 128>}]} {
    %c0 = arith.constant 0 : index
    %c0_0 = arith.constant 0 : index
    %0 = vector.load %arg1[%c0, %c0_0] : memref<16x128xf32, #tpu.memory_space<vmem>>, vector<16x128xf32>
    %cst = arith.constant 0.000000e+00 : f32
    %1 = vector.broadcast %cst : f32 to vector<16x128xf32>
    %2 = arith.cmpf oge, %0, %1 : vector<16x128xf32>
    %cst_1 = arith.constant 1.41421354 : f32
    %3 = vector.broadcast %cst_1 : f32 to vector<16x128xf32>
    %4 = arith.mulf %0, %3 : vector<16x128xf32>
    %cst_2 = arith.constant 0.282842726 : f32
    %5 = vector.broadcast %cst_2 : f32 to vector<16x128xf32>
    %6 = arith.mulf %0, %5 : vector<16x128xf32>
    %7 = arith.select %2, %4, %6 : vector<16x128xi1>, vector<16x128xf32>
    %c0_3 = arith.constant 0 : index
    %c0_4 = arith.constant 0 : index
    %8 = vector.load %arg2[%c0_3, %c0_4] : memref<16x128xf32, #tpu.memory_space<vmem>>, vector<16x128xf32>
    tpu.vector_store %arg2[%c0_3, %c0_4], %7 {strides = array<i32>} : memref<16x128xf32, #tpu.memory_space<vmem>>, vector<16x128xf32>,
    return
  }
  func.func @transform_0(%arg0: i32) -> (i32, i32) {
    %c0_i32 = arith.constant 0 : i32
    %c0_i32_0 = arith.constant 0 : i32
    return %arg0, %c0_i32 : i32, i32
  }
  func.func @transform_1(%arg0: i32) -> (i32, i32) {
    %c0_i32 = arith.constant 0 : i32
    %c0_i32_0 = arith.constant 0 : i32
    return %arg0, %c0_i32 : i32, i32
  }
}

</mosaic_0001>

<bundles_post_ra>
// kernel: tpu_custom_call.1
= control target key start
LH: loop header
LB: loop body
LE: loop exit
PB: predicated region body
PF: predicated region fallthrough
CT: control target
= control target key end

     0   :  { %6 = vsyncpa [#allocation3], 0  ;;  %s132_s0 = inlined_call_operand.hbm [shape: f32[16,128], index: 0, kind: input, shape index: {}]   ;;  %s133_s1 = inlined_call_operand.hbm [shape: f32[16,128], index: 1, kind: output, shape index: {}]  }
   0x1   :  { %7 = vsyncpa [#allocation4], 0  ;;  %s12_s8 = sshll.u32 %s132_s0, 4  ;;  %s112_s9 = smov [#allocation2]   ;;  %s13_s8 = int_to_ptr.hbm [resolvable:$true] %s12_s8 }
   0x2   :  { %s14_s10 = sshll.u32 %s112_s9, 4  ;;  %s113_s11 = smov 128   ;;  %s15_s10 = int_to_ptr.vmem [resolvable:$true] %s14_s10 }
   0x3   :  { %s114_s12 = smov 8  }
   0x4   :  { %20 = dma.hbm_to_vmem [thread:$0]  %s13_s8, 256, %s15_s10, [#allocation3], %s113_s11, %s113_s11, %s114_s12  }
   0x5   :  { %108 = dma.done.wait [#allocation3], 256  }
   0x6   :  { %109 = vsyncadd [#allocation3], 4294967040  ;;  %v25_v0 = vld [vmem:[#allocation2] sm:$0xff]  ;;  %v26_v1 = vld [vmem:[#allocation2 + $0x8] sm:$0xff]  ;;  %s115_s13 = smov [#allocation5]   ;;  %s43_s17 = sshll.u32 %s133_s1, 4  ;;  %s44_s17 = int_to_ptr.hbm [resolvable:$true] %s43_s17 }
   0x7   :  { %s41_s14 = sshll.u32 %s115_s13, 4  ;;  %vm27_vm0 = vcmp.ge.f32.partialorder %v25_v0, 0.0  ;;  %v29_v2 = vmul.f32 1.4142135, %v25_v0  ;;  %v31_v3 = vmul.f32 0.28284273, %v25_v0  ;;  %s42_s14 = int_to_ptr.vmem [resolvable:$true] %s41_s14 }
   0x8   :  { %vm28_vm1 = vcmp.ge.f32.partialorder %v26_v1, 0.0  ;;  %v30_v4 = vmul.f32 1.4142135, %v26_v1  ;;  %v32_v5 = vmul.f32 0.28284273, %v26_v1 }
   0x9   :  { %v33_v6 = vsel %vm27_vm0, %v29_v2, %v31_v3 }
   0xa   :  { %35 = vst [vmem:[#allocation5] sm:$0xff] %v33_v6  ;;  %v34_v7 = vsel %vm28_vm1, %v30_v4, %v32_v5 }
   0xb   :  { %36 = vst [vmem:[#allocation5 + $0x8] sm:$0xff] %v34_v7 }
   0xc   :  { %49 = dma.vmem_to_hbm [thread:$0]  %s42_s14, 256, %s44_s17, [#allocation4], %s113_s11, %s113_s11, %s114_s12  }
   0xd   :  { %110 = dma.done.wait [#allocation4], 256  }
   0xe   :  { %111 = vsyncadd [#allocation4], 4294967040 }
   0xf   :  { %54 = vsyncpa [#allocation3], 1 }
  0x10   :  { %55 = vsyncpa [#allocation4], 1 }

</bundles_post_ra>
